<compile_context>
chip_gen: v5e
topology: v5e:2x2
jax: 0.10.0
libtpu: 0.0.40
codegen_flags: <defaults>
</compile_context>

<pallas_src>
import math

import jax
import jax.numpy as jnp
from jax.experimental import pallas as pl
from jax.experimental.pallas import tpu as pltpu


def highway_kernel(x_ref, w_ref, b_ref, o_ref):
    """Fused highway layer: one MXU matmul + relu/sigmoid + gated residual."""
    e = o_ref.shape[-1]
    x = x_ref[...]

    # Single MXU pass over the fused (E, 2E) weight: columns [0:E] -> proj,
    # columns [E:2E] -> gate.  Accumulate in f32 regardless of input dtype.
    y = jnp.dot(x, w_ref[...], preferred_element_type=jnp.float32) + b_ref[...]

    x_proj = jnp.maximum(y[:, :e], 0.0)      # ReLU    (VPU)
    x_gate = jax.nn.sigmoid(y[:, e:])        # Sigmoid (EUP)

    xf = x.astype(jnp.float32)
    # g*p + (1-g)*x  ==  x + g*(p - x): one fewer vector multiply per element.
    o_ref[...] = (xf + x_gate * (x_proj - xf)).astype(o_ref.dtype)


# Conservative per-TensorCore VMEM budget: fits v7x (64 MiB/TC) with headroom,
# trivially fits v5e/v6e (128 MiB physical).
_VMEM_BUDGET_BYTES = 48 * 1024 * 1024


def _plan_tiling(batch, embed, x_itemsize, w_itemsize, out_itemsize):
    """Pick tile_b (batch tile) and an explicit vmem_limit from a VMEM budget."""
    # Grid-invariant residents: fused weight (E, 2E) + bias (1, 2E).  Budget
    # conservatively for 2 buffers in case single-buffering is unavailable.
    resident = 2 * (embed * 2 * embed + 2 * embed) * w_itemsize

    def vmem_needed(tb):
        streamed = 2 * tb * embed * x_itemsize + 2 * tb * embed * out_itemsize
        temps = tb * 2 * embed * 4 + 2 * tb * embed * 4  # f32 dot result + epilogue temps
        return resident + streamed + temps

    # Keep >=2 grid steps when the batch allows it so the "parallel" axis can
    # shard across v7x's two TensorCores (and so pipelining has work to hide).
    if batch >= 16:
        cap = max(8, (batch // 2) // 8 * 8)
    else:
        cap = 8

    tile_b = 8
    for cand in (512, 256, 128, 64, 32, 16, 8):
        if cand <= cap and vmem_needed(cand) <= _VMEM_BUDGET_BYTES:
            tile_b = cand
            break

    vmem_limit = int(min(max(vmem_needed(tile_b) + (4 << 20), 16 << 20), 60 << 20))
    return tile_b, vmem_limit


def _highway_call(x, w_cat, b_cat, tile_b, vmem_limit, weight_buffer_count):
    b_pad, e = x.shape
    two_e = w_cat.shape[1]

    weight_kwargs = {}
    if weight_buffer_count is not None:
        # Grid-invariant operands: no point double-buffering them in VMEM.
        weight_kwargs["pipeline_mode"] = pl.Buffered(weight_buffer_count)

    return pl.pallas_call(
        highway_kernel,
        out_shape=jax.ShapeDtypeStruct((b_pad, e), x.dtype),
        grid_spec=pltpu.PrefetchScalarGridSpec(
            num_scalar_prefetch=0,
            grid=(b_pad // tile_b,),
            in_specs=[
                pl.BlockSpec((tile_b, e), lambda i: (i, 0)),                   # x tile (streamed)
                pl.BlockSpec((e, two_e), lambda i: (0, 0), **weight_kwargs),   # fused weight (resident)
                pl.BlockSpec((1, two_e), lambda i: (0, 0), **weight_kwargs),   # fused bias (resident)
            ],
            out_specs=pl.BlockSpec((tile_b, e), lambda i: (i, 0)),
        ),
        compiler_params=pltpu.CompilerParams(
            dimension_semantics=("parallel",),
            vmem_limit_bytes=vmem_limit,
        ),
    )(x, w_cat, b_cat)


def highway(x, w_proj, b_proj, w_gate, b_gate):
    """Highway layer via a fused Pallas TPU kernel.

    Arguments use PyTorch nn.Linear layout:
      x:       (B, E)
      w_proj:  (E, E)   y_proj = x @ w_proj.T + b_proj
      b_proj:  (E,)
      w_gate:  (E, E)   y_gate = x @ w_gate.T + b_gate
      b_gate:  (E,)

    Performance notes:
      * E should be a multiple of 128 for lane-dense (unmasked) stores.
      * On v6e/v7x, pass bf16 x / weights to ~double MXU throughput and halve
        VMEM/HBM traffic; accumulation and the epilogue stay in f32.
    """
    batch, embed = x.shape

    # One-time wrapper-side layout plumbing: fuse [proj | gate] so the kernel
    # does a single x @ (E, 2E) matmul instead of two (E, E) ones.
    w_cat = jnp.concatenate([w_proj.T, w_gate.T], axis=1)               # (E, 2E)
    b_cat = jnp.concatenate(
        [b_proj.reshape(1, embed), b_gate.reshape(1, embed)], axis=1)   # (1, 2E)

    tile_b, vmem_limit = _plan_tiling(
        batch, embed, x.dtype.itemsize, w_cat.dtype.itemsize, x.dtype.itemsize)

    # Pad the batch to a multiple of tile_b (remainder handling).
    b_pad = -(-batch // tile_b) * tile_b
    x_in = x if b_pad == batch else jnp.pad(x, ((0, b_pad - batch), (0, 0)))

    # TODO(synk): for very large E (>= ~2048 in f32) on v7x, add an output-embed
    # grid axis tiling w_cat as (E, tile_n) so resident weights fit 64 MiB VMEM.
    try:
        out = _highway_call(x_in, w_cat, b_cat, tile_b, vmem_limit,
                            weight_buffer_count=1)
    except Exception:
        # Some Pallas versions reject single-buffered inputs in the top-level
        # pipeline; fall back to default double-buffering (the VMEM plan above
        # already budgets for 2 weight buffers).
        out = _highway_call(x_in, w_cat, b_cat, tile_b, vmem_limit,
                            weight_buffer_count=None)

    return out if b_pad == batch else out[:batch]


def highway_reference(x, w_proj, b_proj, w_gate, b_gate):
    """Pure-JAX reference matching the PyTorch forward (nn.Linear layout)."""
    x_proj = jax.nn.relu(x @ w_proj.T + b_proj)
    x_gate = jax.nn.sigmoid(x @ w_gate.T + b_gate)
    return x_gate * x_proj + (1.0 - x_gate) * x


if __name__ == "__main__":
    # Small but TPU-friendly shapes: embed is a multiple of 128 (lane-dense
    # stores), batch gives 2 grid steps of an 8-row tile.
    batch, embed = 16, 128

    key = jax.random.PRNGKey(0)
    kx, kwp, kbp, kwg, kbg = jax.random.split(key, 5)

    # nn.Linear default init: U(-1/sqrt(E), 1/sqrt(E)).
    bound = 1.0 / math.sqrt(embed)
    x = jax.random.normal(kx, (batch, embed), dtype=jnp.float32)
    w_proj = jax.random.uniform(kwp, (embed, embed), jnp.float32, -bound, bound)
    b_proj = jax.random.uniform(kbp, (embed,), jnp.float32, -bound, bound)
    w_gate = jax.random.uniform(kwg, (embed, embed), jnp.float32, -bound, bound)
    b_gate = jax.random.uniform(kbg, (embed,), jnp.float32, -bound, bound)

    out = highway(x, w_proj, b_proj, w_gate, b_gate)
    out = jax.block_until_ready(out)

    ref = highway_reference(x, w_proj, b_proj, w_gate, b_gate)
    assert out.shape == (batch, embed)
    assert jnp.allclose(out, ref, atol=2e-5, rtol=2e-5), "mismatch vs reference"

    print("KERNEL_OK")
</pallas_src>

<mosaic_0001>
module attributes {stable_mosaic.version = 11 : i64} {
  func.func @highway_kernel(%arg0: i32, %arg1: memref<8x128xf32, #tpu.memory_space<vmem>>, %arg2: memref<128x256xf32, #tpu.memory_space<vmem>>, %arg3: memref<1x256xf32, #tpu.memory_space<vmem>>, %arg4: memref<8x128xf32, #tpu.memory_space<vmem>>) attributes {dimension_semantics = [#tpu.dimension_semantics<parallel>], iteration_bounds = array<i64: 2>, scalar_prefetch = 0 : i64, scratch_operands = 0 : i64, tpu.core_type = #tpu.core_type<tc>, window_params = [{transform_indices = @transform_0, window_bounds = array<i64: 8, 128>}, {pipeline_mode = #tpu.pipeline_mode<synchronous>, transform_indices = @transform_1, window_bounds = array<i64: 128, 256>}, {pipeline_mode = #tpu.pipeline_mode<synchronous>, transform_indices = @transform_2, window_bounds = array<i64: 1, 256>}, {transform_indices = @transform_3, window_bounds = array<i64: 8, 128>}]} {
    %c0 = arith.constant 0 : index
    %c0_0 = arith.constant 0 : index
    %0 = vector.load %arg1[%c0, %c0_0] : memref<8x128xf32, #tpu.memory_space<vmem>>, vector<8x128xf32>
    %c0_1 = arith.constant 0 : index
    %c0_2 = arith.constant 0 : index
    %1 = vector.load %arg2[%c0_1, %c0_2] : memref<128x256xf32, #tpu.memory_space<vmem>>, vector<128x256xf32>
    %cst = arith.constant dense<0.000000e+00> : vector<8x256xf32>
    %2 = tpu.matmul %0, %1, %cst {dimension_numbers = #tpu.dot_dimension_numbers<[1], [0], [0], [1], [0, 0, 1, 1], [], []>} : vector<8x128xf32>, vector<128x256xf32>, vector<8x256xf32> -> vector<8x256xf32>
    %c0_3 = arith.constant 0 : index
    %c0_4 = arith.constant 0 : index
    %3 = vector.load %arg3[%c0_3, %c0_4] : memref<1x256xf32, #tpu.memory_space<vmem>>, vector<1x256xf32>
    %4 = vector.broadcast %3 : vector<1x256xf32> to vector<8x256xf32>
    %5 = arith.addf %2, %4 : vector<8x256xf32>
    %6 = vector.extract_strided_slice %5 {offsets = [0, 0], sizes = [8, 128], strides = [1, 1]} : vector<8x256xf32> to vector<8x128xf32>
    %cst_5 = arith.constant 0.000000e+00 : f32
    %7 = vector.broadcast %cst_5 : f32 to vector<8x128xf32>
    %8 = arith.maximumf %6, %7 : vector<8x128xf32>
    %9 = vector.extract_strided_slice %5 {offsets = [0, 128], sizes = [8, 128], strides = [1, 1]} : vector<8x256xf32> to vector<8x128xf32>
    %10 = arith.negf %9 : vector<8x128xf32>
    %11 = math.exp %10 : vector<8x128xf32>
    %cst_6 = arith.constant 1.000000e+00 : f32
    %12 = vector.broadcast %cst_6 : f32 to vector<8x128xf32>
    %13 = arith.addf %12, %11 : vector<8x128xf32>
    %14 = arith.divf %12, %13 : vector<8x128xf32>
    %15 = arith.subf %8, %0 : vector<8x128xf32>
    %16 = arith.mulf %14, %15 : vector<8x128xf32>
    %17 = arith.addf %0, %16 : vector<8x128xf32>
    %c0_7 = arith.constant 0 : index
    %c0_8 = arith.constant 0 : index
    %18 = vector.load %arg4[%c0_7, %c0_8] : memref<8x128xf32, #tpu.memory_space<vmem>>, vector<8x128xf32>
    tpu.vector_store %arg4[%c0_7, %c0_8], %17 {strides = array<i32>} : memref<8x128xf32, #tpu.memory_space<vmem>>, vector<8x128xf32>,
    return
  }
  func.func @transform_0(%arg0: i32) -> (i32, i32) {
    %c0_i32 = arith.constant 0 : i32
    %c0_i32_0 = arith.constant 0 : i32
    return %arg0, %c0_i32 : i32, i32
  }
  func.func @transform_1(%arg0: i32) -> (i32, i32) {
    %c0_i32 = arith.constant 0 : i32
    %c0_i32_0 = arith.constant 0 : i32
    %c0_i32_1 = arith.constant 0 : i32
    return %c0_i32, %c0_i32_0 : i32, i32
  }
  func.func @transform_2(%arg0: i32) -> (i32, i32) {
    %c0_i32 = arith.constant 0 : i32
    %c0_i32_0 = arith.constant 0 : i32
    %c0_i32_1 = arith.constant 0 : i32
    return %c0_i32, %c0_i32_0 : i32, i32
  }
  func.func @transform_3(%arg0: i32) -> (i32, i32) {
    %c0_i32 = arith.constant 0 : i32
    %c0_i32_0 = arith.constant 0 : i32
    return %arg0, %c0_i32 : i32, i32
  }
}

module attributes {stable_mosaic.version = 11 : i64} {
  func.func @highway_kernel(%arg0: i32, %arg1: memref<8x128xf32, #tpu.memory_space<vmem>>, %arg2: memref<128x256xf32, #tpu.memory_space<vmem>>, %arg3: memref<1x256xf32, #tpu.memory_space<vmem>>, %arg4: memref<8x128xf32, #tpu.memory_space<vmem>>) attributes {dimension_semantics = [#tpu.dimension_semantics<parallel>], iteration_bounds = array<i64: 2>, scalar_prefetch = 0 : i64, scratch_operands = 0 : i64, tpu.core_type = #tpu.core_type<tc>, window_params = [{transform_indices = @transform_0, window_bounds = array<i64: 8, 128>}, {pipeline_mode = #tpu.pipeline_mode<synchronous>, transform_indices = @transform_1, window_bounds = array<i64: 128, 256>}, {pipeline_mode = #tpu.pipeline_mode<synchronous>, transform_indices = @transform_2, window_bounds = array<i64: 1, 256>}, {transform_indices = @transform_3, window_bounds = array<i64: 8, 128>}]} {
    %c0 = arith.constant 0 : index
    %c0_0 = arith.constant 0 : index
    %0 = vector.load %arg1[%c0, %c0_0] : memref<8x128xf32, #tpu.memory_space<vmem>>, vector<8x128xf32>
    %c0_1 = arith.constant 0 : index
    %c0_2 = arith.constant 0 : index
    %1 = vector.load %arg2[%c0_1, %c0_2] : memref<128x256xf32, #tpu.memory_space<vmem>>, vector<128x256xf32>
    %cst = arith.constant dense<0.000000e+00> : vector<8x256xf32>
    %2 = tpu.matmul %0, %1, %cst {dimension_numbers = #tpu.dot_dimension_numbers<[1], [0], [0], [1], [0, 0, 1, 1], [], []>} : vector<8x128xf32>, vector<128x256xf32>, vector<8x256xf32> -> vector<8x256xf32>
    %c0_3 = arith.constant 0 : index
    %c0_4 = arith.constant 0 : index
    %3 = vector.load %arg3[%c0_3, %c0_4] : memref<1x256xf32, #tpu.memory_space<vmem>>, vector<1x256xf32>
    %4 = vector.broadcast %3 : vector<1x256xf32> to vector<8x256xf32>
    %5 = arith.addf %2, %4 : vector<8x256xf32>
    %6 = vector.extract_strided_slice %5 {offsets = [0, 0], sizes = [8, 128], strides = [1, 1]} : vector<8x256xf32> to vector<8x128xf32>
    %cst_5 = arith.constant 0.000000e+00 : f32
    %7 = vector.broadcast %cst_5 : f32 to vector<8x128xf32>
    %8 = arith.maximumf %6, %7 : vector<8x128xf32>
    %9 = vector.extract_strided_slice %5 {offsets = [0, 128], sizes = [8, 128], strides = [1, 1]} : vector<8x256xf32> to vector<8x128xf32>
    %10 = arith.negf %9 : vector<8x128xf32>
    %11 = math.exp %10 : vector<8x128xf32>
    %cst_6 = arith.constant 1.000000e+00 : f32
    %12 = vector.broadcast %cst_6 : f32 to vector<8x128xf32>
    %13 = arith.addf %12, %11 : vector<8x128xf32>
    %14 = arith.divf %12, %13 : vector<8x128xf32>
    %15 = arith.subf %8, %0 : vector<8x128xf32>
    %16 = arith.mulf %14, %15 : vector<8x128xf32>
    %17 = arith.addf %0, %16 : vector<8x128xf32>
    %c0_7 = arith.constant 0 : index
    %c0_8 = arith.constant 0 : index
    %18 = vector.load %arg4[%c0_7, %c0_8] : memref<8x128xf32, #tpu.memory_space<vmem>>, vector<8x128xf32>
    tpu.vector_store %arg4[%c0_7, %c0_8], %17 {strides = array<i32>} : memref<8x128xf32, #tpu.memory_space<vmem>>, vector<8x128xf32>,
    return
  }
  func.func @transform_0(%arg0: i32) -> (i32, i32) {
    %c0_i32 = arith.constant 0 : i32
    %c0_i32_0 = arith.constant 0 : i32
    return %arg0, %c0_i32 : i32, i32
  }
  func.func @transform_1(%arg0: i32) -> (i32, i32) {
    %c0_i32 = arith.constant 0 : i32
    %c0_i32_0 = arith.constant 0 : i32
    %c0_i32_1 = arith.constant 0 : i32
    return %c0_i32, %c0_i32_0 : i32, i32
  }
  func.func @transform_2(%arg0: i32) -> (i32, i32) {
    %c0_i32 = arith.constant 0 : i32
    %c0_i32_0 = arith.constant 0 : i32
    %c0_i32_1 = arith.constant 0 : i32
    return %c0_i32, %c0_i32_0 : i32, i32
  }
  func.func @transform_3(%arg0: i32) -> (i32, i32) {
    %c0_i32 = arith.constant 0 : i32
    %c0_i32_0 = arith.constant 0 : i32
    return %arg0, %c0_i32 : i32, i32
  }
}

</mosaic_0001>

<bundles_post_ra>
// kernel: tpu_custom_call.1
= control target key start
LH: loop header
LB: loop body
LE: loop exit
PB: predicated region body
PF: predicated region fallthrough
CT: control target
= control target key end

     0   :  { %8 = vsyncpa [#allocation3], 0  ;;  %s855_s0 = inlined_call_operand.hbm [shape: f32[16,128], index: 0, kind: input, shape index: {}]   ;;  %s856_s1 = inlined_call_operand.hbm [shape: f32[128,256], index: 1, kind: input, shape index: {}]   ;;  %s857_s2 = inlined_call_operand.hbm [shape: f32[1,256], index: 2, kind: input, shape index: {}]   ;;  %s858_s3 = inlined_call_operand.hbm [shape: f32[16,128], index: 3, kind: output, shape index: {}]  }
   0x1   :  { %10 = vsyncpa [#allocation3 + $0x1], 0 }
   0x2   :  { %11 = vsyncpa [#allocation6], 0 }
   0x3   :  { %12 = vsyncpa [#allocation4], 0 }
   0x4   :  { %14 = vsyncpa [#allocation4 + $0x1], 0  ;;  %s703_s12 = smov 0   ;;  %s705_s13 = smov 0  }
   0x5   :  { %s707_s14 = smov 0   ;;  %s709_s15 = smov 0  }
   0x6 LB: > { %s130_s18 = sshll.u32 %s856_s1, 4  ;;  %s727_s19 = sadd.s32 4294967295, %s677_s15   ;;  %s677_s15 = sphi %s709_s15, %s869_s15   ;;  %s673_s14 = sphi %s707_s14, %s868_s14   ;;  %s669_s13 = sphi %s705_s13, %s867_s13   ;;  %s665_s12 = sphi %s703_s12, %s866_s12   ;;  %s131_s18 = int_to_ptr.hbm [resolvable:$true] %s130_s18 }
   0x7   : > { %p428_p0 = scmp.ge.s32.totalorder %s677_s15, 1  ;;  %p41_p1 = scmp.eq.s32.totalorder %s727_s19, 0 }
   0x8   : > { %p119_p2 = scmp.lt.s32.totalorder %s677_s15, 3  ;;  %s679_s21 = smov [#allocation5]  }
   0x9   : > { %s132_s22 = sshll.u32 %s679_s21, 4  ;;  %s145_s25 = sshll.u32 %s857_s2, 4  ;;  %s133_s22 = int_to_ptr.vmem [resolvable:$true] %s132_s22  ;;  %s146_s25 = int_to_ptr.hbm [resolvable:$true] %s145_s25 }
   0xa   : > { %p732_p3 = pnand %p428_p0, %p119_p2  ;;  %s680_s26 = smov [#allocation7]  }
   0xb   : > { %s147_s27 = sshll.u32 %s680_s26, 4  ;;  %s681_s28 = smov 256   ;;  %s148_s27 = int_to_ptr.vmem [resolvable:$true] %s147_s27 }
   0xc   : > { %p456_p4 = pneg %p732_p3  ;;  %s682_s29 = smov 16  }
   0xd   : > { %s427_s30 = sadd.s32 4294967294, %s677_s15   ;;  %s746_s4 = sadd.s32 1, %s677_s15  }
   0xe   : > { %p457_p6 = pnand %p456_p4, %p41_p1  ;;  %s24_s5 = ssub.s32 %s677_s15, %s746_s4 }
   0xf   : > { %s27_s6 = sadd.s32 1, %s673_s14  ;;  %p25_p7 = scmp.eq.s32.totalorder %s24_s5, 0 }
  0x10   : > { %459 = dma.hbm_to_vmem [thread:$0]  (!%p457_p6), %s131_s18, 4096, %s133_s22, [#allocation6], %s681_s28, %s681_s28, %s682_s29  }
  0x11   : > { %462 = dma.hbm_to_vmem [thread:$0]  (!%p457_p6), %s146_s25, 32, %s148_s27, [#allocation6]  }
  0x12   : > { %p34_p8 = scmp.ne.s32.totalorder %s673_s14, %s669_s13  ;;  %p35_p9 = scmp.eq.s32.totalorder %s677_s15, 0 }
  0x13   : > { %p40_p10 = scmp.ne.s32.totalorder %s669_s13, %s665_s12  ;;  %p106_p13 = scmp.eq.s32.totalorder %s727_s19, 1 }
  0x14   : > { %s757_s7 = scalar_select %p25_p7, %s673_s14, %s27_s6  }
  0x15   : > { %p759_p11 = por %p35_p9, %p34_p8  ;;  %p765_p12 = por %p41_p1, %p40_p10 }
  0x16   : > { %p112_p0 = scmp.eq.s32.totalorder %s427_s30, 1  ;;  %p473_p2 = scmp.lt.s32.totalorder %s677_s15, 2 }
  0x17   : > { %s158_s10 = sand.u32 1, %s673_s14   ;;  %p772_p4 = por %p106_p13, %p34_p8 }
  0x18   : > { %p776_p6 = por %p112_p0, %p40_p10  ;;  %s432_s17 = sshll.u32 %s158_s10, 3 }
  0x19   : > { %s433_s18 = sshll.u32 %s677_s15, 3  ;;  %s162_s24 = scalar_lea.vmem [#allocation2], %s432_s17 }
  0x1a   : > { %s166_s23 = scalar_lea.hbm %s855_s0, %s433_s18  ;;  %s170_s25 = sshll.u32 %s162_s24, 4  ;;  %s171_s25 = int_to_ptr.vmem [resolvable:$true] %s170_s25 }
  0x1b   : > { %s168_s26 = sshll.u32 %s166_s23, 4  ;;  %p786_p7 = pnand %p473_p2, %p759_p11  ;;  %s169_s26 = int_to_ptr.hbm [resolvable:$true] %s168_s26 }
  0x1c   : > { %s159_s28 = scalar_lea.sflag [#allocation3], %s158_s10  ;;  %s577_s29 = sshra.s32 %s169_s26, 4  ;;  %s578_s29 = int_to_ptr.hbm [resolvable:$true] %s577_s29 }
  0x1d   : > { %s579_s30 = scalar_lea.hbm %s578_s29, 8  ;;  %p581_p9 = pneg %p786_p7 }
  0x1e   : > { %p580_p8 = scmp.ne.s32.totalorder %s578_s29, %s579_s30  ;;  %s584_s17 = scalar_lea.hbm %s855_s0, 16 }
  0x1f   : > { %p585_p11 = scmp.lt.s32.totalorder %s578_s29, %s855_s0  ;;  %p586_p0 = scmp.lt.s32.totalorder %s584_s17, %s579_s30 }
  0x20   : > { %p582_p10 = pnand %p581_p9, %p580_p8 }
  0x21   : > { %p587_p2 = por %p586_p0, %p585_p11 }
  0x22   : > { %p583_p13 = pneg %p582_p10 }
  0x24   : > { %p588_p5 = pnand %p587_p2, %p583_p13 }
  0x26   : > { %591 = shalt.err (!%p588_p5)
}
  0x27   : > { %466 = dma.hbm_to_vmem [thread:$0]  (!%p786_p7), %s169_s26, 128, %s171_s25, %s159_s28  }
  0x28   : > { %179 = sbr.rel (%p732_p3) target bundleno = 243 (0xf3), region = 32  ;;  %s803_s10 = sand.u32 (!%p732_p3), 1, %s669_s13  }
  0x29   : > { %s435_s21 = sshll.u32 (!%p732_p3), %s803_s10, 3  ;;  %s182_s22 = scalar_lea.sflag (!%p732_p3), [#allocation3], %s803_s10 }
  0x2a   : > { %s809_s23 = scalar_lea.vmem (!%p732_p3), [#allocation2], %s435_s21 }
  0x2d   : > { %652 = dma.done.wait (%p765_p12), %s182_s22, 128  }
  0x2e   : > { %654 = vsyncadd (%p765_p12), %s182_s22, 4294967168 }
  0x2f   : > { %656 = dma.done.wait (%p41_p1), [#allocation6], 4128  }
  0x30   : > { %658 = vsyncadd (%p41_p1), [#allocation6], 4294963168  ;;  %v251_v0 = vld [vmem:[#allocation5 + $0xf8] sm:$0xff]  ;;  %v249_v1 = vld [vmem:[#allocation5 + $0xe8] sm:$0xff]  ;;  %s441_s20 = sshll.u32 %s727_s19, 3  ;;  %s218_s26 = scalar_lea.vmem [#allocation8], %s435_s21 }
  0x31   : > { %278 = vmatpush.msra.mxu1 %v251_v0  ;;  %v247_v2 = vld [vmem:[#allocation5 + $0xd8] sm:$0xff]  ;;  %v245_v3 = vld [vmem:[#allocation5 + $0xc8] sm:$0xff]  ;;  %v250_v4 = vld [vmem:[#allocation5 + $0xf0] sm:$0xff]  ;;  %s333_s25 = scalar_lea.hbm %s858_s3, %s441_s20  ;;  %s335_s19 = sshll.u32 %s218_s26, 4  ;;  %s336_s19 = int_to_ptr.vmem [resolvable:$true] %s335_s19 }
  0x32   : > { %v248_v5 = vld [vmem:[#allocation5 + $0xe0] sm:$0xff]  ;;  %258 = vmatpush.msra.mxu0 %v250_v4  ;;  %v243_v6 = vld [vmem:[#allocation5 + $0xb8] sm:$0xff]  ;;  %v246_v7 = vld [vmem:[#allocation5 + $0xd0] sm:$0xff]  ;;  %s337_s27 = sshll.u32 %s333_s25, 4  ;;  %s323_s28 = scalar_lea.sflag [#allocation4], %s803_s10  ;;  %s338_s27 = int_to_ptr.hbm [resolvable:$true] %s337_s27 }
  0x33   : > { %279 = vmatpush.msra.mxu1 %v249_v1  ;;  %v241_v8 = vld [vmem:[#allocation5 + $0xa8] sm:$0xff]  ;;  %v244_v9 = vld [vmem:[#allocation5 + $0xc0] sm:$0xff]  ;;  %v239_v10 = vld [vmem:[#allocation5 + $0x98] sm:$0xff]  ;;  %s621_s29 = sshra.s32 %s338_s27, 4  ;;  %s627_s17 = scalar_lea.hbm %s858_s3, 16  ;;  %s622_s29 = int_to_ptr.hbm [resolvable:$true] %s621_s29 }
  0x34   : > { %259 = vmatpush.msra.mxu0 %v248_v5  ;;  %v242_v11 = vld [vmem:[#allocation5 + $0xb0] sm:$0xff]  ;;  %v237_v12 = vld [vmem:[#allocation5 + $0x88] sm:$0xff]  ;;  %v240_v13 = vld [vmem:[#allocation5 + $0xa0] sm:$0xff]  ;;  %s623_s30 = scalar_lea.hbm %s622_s29, 8  ;;  %p628_p12 = scmp.lt.s32.totalorder %s622_s29, %s858_s3 }
  0x35   : > { %280 = vmatpush.msra.mxu1 %v247_v2  ;;  %v235_v14 = vld [vmem:[#allocation5 + $0x78] sm:$0xff]  ;;  %v238_v15 = vld [vmem:[#allocation5 + $0x90] sm:$0xff]  ;;  %v233_v16 = vld [vmem:[#allocation5 + $0x68] sm:$0xff]  ;;  %p624_p1 = scmp.ne.s32.totalorder %s622_s29, %s623_s30  ;;  %p629_p7 = scmp.lt.s32.totalorder %s627_s17, %s623_s30 }
  0x36   : > { %260 = vmatpush.msra.mxu0 %v246_v7  ;;  %v236_v17 = vld [vmem:[#allocation5 + $0x80] sm:$0xff]  ;;  %v231_v18 = vld [vmem:[#allocation5 + $0x58] sm:$0xff]  ;;  %v234_v19 = vld [vmem:[#allocation5 + $0x70] sm:$0xff] }
  0x37   : > { %281 = vmatpush.msra.mxu1 %v245_v3  ;;  %v229_v20 = vld [vmem:[#allocation5 + $0x48] sm:$0xff]  ;;  %v232_v21 = vld [vmem:[#allocation5 + $0x60] sm:$0xff]  ;;  %v227_v22 = vld [vmem:[#allocation5 + $0x38] sm:$0xff]  ;;  %p625_p3 = pnand %p624_p1, %p772_p4  ;;  %p630_p8 = por %p629_p7, %p628_p12 }
  0x38   : > { %261 = vmatpush.msra.mxu0 %v244_v9  ;;  %v230_v23 = vld [vmem:[#allocation5 + $0x50] sm:$0xff]  ;;  %v225_v24 = vld [vmem:[#allocation5 + $0x28] sm:$0xff]  ;;  %v228_v25 = vld [vmem:[#allocation5 + $0x40] sm:$0xff] }
  0x39   : > { %282 = vmatpush.msra.mxu1 %v243_v6  ;;  %v223_v26 = vld [vmem:[#allocation5 + $0x18] sm:$0xff]  ;;  %v226_v27 = vld [vmem:[#allocation5 + $0x30] sm:$0xff]  ;;  %v221_v28 = vld [vmem:[#allocation5 + $0x8] sm:$0xff]  ;;  %p626_p5 = pneg %p625_p3 }
  0x3a   : > { %262 = vmatpush.msra.mxu0 %v242_v11  ;;  %v224_v29 = vld [vmem:[#allocation5 + $0x20] sm:$0xff]  ;;  %v219_v30 = vld [vmem:[%s809_s23] sm:$0xff] }
  0x3b   : > { %283 = vmatpush.msra.mxu1 %v241_v8  ;;  %v222_v31 = vld [vmem:[#allocation5 + $0x10] sm:$0xff]  ;;  %v220_v32 = vld [vmem:[#allocation5] sm:$0xff]  ;;  %p631_p9 = pnand %p630_p8, %p626_p5 }
  0x3c   : > { %263 = vmatpush.msra.mxu0 %v240_v13  ;;  %v252_v33 = vld [vmem:[#allocation7] sm:$0x3] }
  0x3d   : > { %284 = vmatpush.msra.mxu1 %v239_v10  ;;  %v255_v34 = vperm.slane %v252_v33, 1  ;;  %v254_v40 = vperm.slane %v252_v33, 0 }
  0x3e   : > { %264 = vmatpush.msra.mxu0 %v238_v15 }
  0x3f   : > { %285 = vmatpush.msra.mxu1 %v237_v12 }
  0x40   : > { %265 = vmatpush.msra.mxu0 %v236_v17 }
  0x41   : > { %286 = vmatpush.msra.mxu1 %v235_v14 }
  0x42   : > { %266 = vmatpush.msra.mxu0 %v234_v19 }
  0x43   : > { %287 = vmatpush.msra.mxu1 %v233_v16 }
  0x44   : > { %267 = vmatpush.msra.mxu0 %v232_v21 }
  0x45   : > { %288 = vmatpush.msra.mxu1 %v231_v18 }
  0x46   : > { %268 = vmatpush.msra.mxu0 %v230_v23 }
  0x47   : > { %289 = vmatpush.msra.mxu1 %v229_v20 }
  0x48   : > { %269 = vmatpush.msra.mxu0 %v228_v25 }
  0x49   : > { %290 = vmatpush.msra.mxu1 %v227_v22 }
  0x4a   : > { %270 = vmatpush.msra.mxu0 %v226_v27 }
  0x4b   : > { %291 = vmatpush.msra.mxu1 %v225_v24 }
  0x4c   : > { %271 = vmatpush.msra.mxu0 %v224_v29 }
  0x4d   : > { %292 = vmatpush.msra.mxu1 %v223_v26 }
  0x4e   : > { %272 = vmatpush.msra.mxu0 %v222_v31 }
  0x4f   : > { %293 = vmatpush.msra.mxu1 %v221_v28 }
  0x50   : > { %294 = vmatmul.f32.vlgmr.msra.gmra.mxu1 %v219_v30  ;;  %273 = vmatpush.msra.mxu0 %v220_v32 }
  0x51   : > { %274 = vmatmul.f32.vlgmr.msra.gmra.mxu0 %v219_v30 }
  0xcd   : > { %v295_v35 = vpop.f32.mrf.mxu1 }
  0xce   : > { %v296_v36 = vadd.f32 %v295_v35, %v255_v34  ;;  %v275_v41 = vpop.f32.mrf.mxu0 }
  0xcf   : > { %v276_v42 = vadd.f32 %v275_v41, %v254_v40 }
  0xd0   : > { %v439_v37 = vmul.f32 -1.442695, %v296_v36 }
  0xd1   : > { %v298_v46 = vmax.f32 %v276_v42, 0.0 }
  0xd2   : > { %513 = vpow2.f32 %v439_v37 }
  0xd3   : > { %v318_v51 = vsub.f32 %v298_v46, %v219_v30 }
  0xd8   : > { %v514_v38 = vpop.eup %513 }
  0xd9   : > { %v302_v39 = vadd.f32 1.0, %v514_v38 }
  0xdb   : > { %515 = vrcp.f32 %v302_v39  ;;  %v314_v47 = vand.u32 2147483648, %v302_v39  ;;  %v312_v49 = vand.u32 2147483647, %v302_v39  ;;  %vm308_vm1 = vweird.f32 %v302_v39 }
  0xdd   : > { %v315_v52 = vor.u32 1.1754944e-38, %v314_v47  ;;  %vm313_vm3 = vcmp.eq.f32.partialorder %v312_v49, 8.507059e+37 }
  0xe1   : > { %v516_v43 = vpop.eup %515 }
  0xe2   : > { %v304_v44 = vmul.f32 %v516_v43, %v302_v39  ;;  %vm309_vm0 = vweird.f32 %v516_v43 }
  0xe3   : > { %vm310_vm2 = vmor %vm308_vm1, %vm309_vm0 }
  0xe4   : > { %v305_v45 = vsub.f32 1.0, %v304_v44 }
  0xe6   : > { %v306_v48 = vmul.f32 %v516_v43, %v305_v45 }
  0xe8   : > { %v307_v50 = vadd.f32 %v516_v43, %v306_v48 }
  0xea   : > { %v311_v53 = vsel %vm310_vm2, %v516_v43, %v307_v50 }
  0xeb   : > { %v316_v54 = vsel %vm313_vm3, %v315_v52, %v311_v53 }
  0xec   : > { %v319_v55 = vmul.f32 %v318_v51, %v316_v54 }
  0xee   : > { %v320_v56 = vadd.f32 %v319_v55, %v219_v30 }
  0xf0   : > { %321 = vst [vmem:[%s218_s26] sm:$0xff] %v320_v56 }
  0xf1   : > { %634 = shalt.err (!%p631_p9)
}
  0xf2   : > { %454 = dma.vmem_to_hbm [thread:$0]  (%p772_p4), %s336_s19, 128, %s338_s27, %s323_s28  }
  0xf3 PF: > { %s349_s10 = sand.u32 1, %s665_s12   ;;  %p865_p10 = scmp.ge.s32.totalorder %s677_s15, 2 }
  0xf4   : > { %s350_s21 = scalar_lea.sflag [#allocation4], %s349_s10 }
  0xf5   : > { %p468_p13 = pnand %p865_p10, %p776_p6 }
  0xf7   : > { %p469_p11 = pneg %p468_p13 }
  0xf9   : > { %660 = dma.done.wait (%p469_p11), %s350_s21, 128  }
  0xfa   : > { %662 = vsyncadd (%p469_p11), %s350_s21, 4294967168  ;;  %p17_p0 = scmp.ge.s32.totalorder %s746_s4, 4   ;;  %s866_s12 = smov %s669_s13 }
  0xfb   : > { %s867_s13 = smov %s673_s14  ;;  %s868_s14 = smov %s757_s7 }
  0xfc   : > { %s869_s15 = smov %s746_s4  ;;  %19 = sbr.rel (!%p17_p0) target bundleno = 6 (0x6), region = 85 }
 0x101   :  { %356 = vsyncpa [#allocation3], 1 }
 0x102   :  { %358 = vsyncpa [#allocation3 + $0x1], 1 }
 0x103   :  { %359 = vsyncpa [#allocation6], 1 }
 0x104   :  { %360 = vsyncpa [#allocation4], 1 }
 0x105   :  { %362 = vsyncpa [#allocation4 + $0x1], 1 }

// kernel: tpu_custom_call.1
= control target key start
LH: loop header
LB: loop body
LE: loop exit
PB: predicated region body
PF: predicated region fallthrough
CT: control target
= control target key end

     0   :  { %8 = vsyncpa [#allocation3], 0  ;;  %s855_s0 = inlined_call_operand.hbm [shape: f32[16,128], index: 0, kind: input, shape index: {}]   ;;  %s856_s1 = inlined_call_operand.hbm [shape: f32[128,256], index: 1, kind: input, shape index: {}]   ;;  %s857_s2 = inlined_call_operand.hbm [shape: f32[1,256], index: 2, kind: input, shape index: {}]   ;;  %s858_s3 = inlined_call_operand.hbm [shape: f32[16,128], index: 3, kind: output, shape index: {}]  }
   0x1   :  { %10 = vsyncpa [#allocation3 + $0x1], 0 }
   0x2   :  { %11 = vsyncpa [#allocation6], 0 }
   0x3   :  { %12 = vsyncpa [#allocation4], 0 }
   0x4   :  { %14 = vsyncpa [#allocation4 + $0x1], 0  ;;  %s703_s12 = smov 0   ;;  %s705_s13 = smov 0  }
   0x5   :  { %s707_s14 = smov 0   ;;  %s709_s15 = smov 0  }
   0x6 LB: > { %s130_s18 = sshll.u32 %s856_s1, 4  ;;  %s727_s19 = sadd.s32 4294967295, %s677_s15   ;;  %s677_s15 = sphi %s709_s15, %s869_s15   ;;  %s673_s14 = sphi %s707_s14, %s868_s14   ;;  %s669_s13 = sphi %s705_s13, %s867_s13   ;;  %s665_s12 = sphi %s703_s12, %s866_s12   ;;  %s131_s18 = int_to_ptr.hbm [resolvable:$true] %s130_s18 }
   0x7   : > { %p428_p0 = scmp.ge.s32.totalorder %s677_s15, 1  ;;  %p41_p1 = scmp.eq.s32.totalorder %s727_s19, 0 }
   0x8   : > { %p119_p2 = scmp.lt.s32.totalorder %s677_s15, 3  ;;  %s679_s21 = smov [#allocation5]  }
   0x9   : > { %s132_s22 = sshll.u32 %s679_s21, 4  ;;  %s145_s25 = sshll.u32 %s857_s2, 4  ;;  %s133_s22 = int_to_ptr.vmem [resolvable:$true] %s132_s22  ;;  %s146_s25 = int_to_ptr.hbm [resolvable:$true] %s145_s25 }
   0xa   : > { %p732_p3 = pnand %p428_p0, %p119_p2  ;;  %s680_s26 = smov [#allocation7]  }
   0xb   : > { %s147_s27 = sshll.u32 %s680_s26, 4  ;;  %s681_s28 = smov 256   ;;  %s148_s27 = int_to_ptr.vmem [resolvable:$true] %s147_s27 }
   0xc   : > { %p456_p4 = pneg %p732_p3  ;;  %s682_s29 = smov 16  }
   0xd   : > { %s427_s30 = sadd.s32 4294967294, %s677_s15   ;;  %s746_s4 = sadd.s32 1, %s677_s15  }
   0xe   : > { %p457_p6 = pnand %p456_p4, %p41_p1  ;;  %s24_s5 = ssub.s32 %s677_s15, %s746_s4 }
   0xf   : > { %s27_s6 = sadd.s32 1, %s673_s14  ;;  %p25_p7 = scmp.eq.s32.totalorder %s24_s5, 0 }
  0x10   : > { %459 = dma.hbm_to_vmem [thread:$0]  (!%p457_p6), %s131_s18, 4096, %s133_s22, [#allocation6], %s681_s28, %s681_s28, %s682_s29  }
  0x11   : > { %462 = dma.hbm_to_vmem [thread:$0]  (!%p457_p6), %s146_s25, 32, %s148_s27, [#allocation6]  }
  0x12   : > { %p34_p8 = scmp.ne.s32.totalorder %s673_s14, %s669_s13  ;;  %p35_p9 = scmp.eq.s32.totalorder %s677_s15, 0 }
  0x13   : > { %p40_p10 = scmp.ne.s32.totalorder %s669_s13, %s665_s12  ;;  %p106_p13 = scmp.eq.s32.totalorder %s727_s19, 1 }
  0x14   : > { %s757_s7 = scalar_select %p25_p7, %s673_s14, %s27_s6  }
  0x15   : > { %p759_p11 = por %p35_p9, %p34_p8  ;;  %p765_p12 = por %p41_p1, %p40_p10 }
  0x16   : > { %p112_p0 = scmp.eq.s32.totalorder %s427_s30, 1  ;;  %p473_p2 = scmp.lt.s32.totalorder %s677_s15, 2 }
  0x17   : > { %s158_s10 = sand.u32 1, %s673_s14   ;;  %p772_p4 = por %p106_p13, %p34_p8 }
  0x18   : > { %p776_p6 = por %p112_p0, %p40_p10  ;;  %s432_s17 = sshll.u32 %s158_s10, 3 }
  0x19   : > { %s433_s18 = sshll.u32 %s677_s15, 3  ;;  %s162_s24 = scalar_lea.vmem [#allocation2], %s432_s17 }
  0x1a   : > { %s166_s23 = scalar_lea.hbm %s855_s0, %s433_s18  ;;  %s170_s25 = sshll.u32 %s162_s24, 4  ;;  %s171_s25 = int_to_ptr.vmem [resolvable:$true] %s170_s25 }
  0x1b   : > { %s168_s26 = sshll.u32 %s166_s23, 4  ;;  %p786_p7 = pnand %p473_p2, %p759_p11  ;;  %s169_s26 = int_to_ptr.hbm [resolvable:$true] %s168_s26 }
  0x1c   : > { %s159_s28 = scalar_lea.sflag [#allocation3], %s158_s10  ;;  %s577_s29 = sshra.s32 %s169_s26, 4  ;;  %s578_s29 = int_to_ptr.hbm [resolvable:$true] %s577_s29 }
  0x1d   : > { %s579_s30 = scalar_lea.hbm %s578_s29, 8  ;;  %p581_p9 = pneg %p786_p7 }
  0x1e   : > { %p580_p8 = scmp.ne.s32.totalorder %s578_s29, %s579_s30  ;;  %s584_s17 = scalar_lea.hbm %s855_s0, 16 }
  0x1f   : > { %p585_p11 = scmp.lt.s32.totalorder %s578_s29, %s855_s0  ;;  %p586_p0 = scmp.lt.s32.totalorder %s584_s17, %s579_s30 }
  0x20   : > { %p582_p10 = pnand %p581_p9, %p580_p8 }
  0x21   : > { %p587_p2 = por %p586_p0, %p585_p11 }
  0x22   : > { %p583_p13 = pneg %p582_p10 }
  0x24   : > { %p588_p5 = pnand %p587_p2, %p583_p13 }
  0x26   : > { %591 = shalt.err (!%p588_p5)
}
  0x27   : > { %466 = dma.hbm_to_vmem [thread:$0]  (!%p786_p7), %s169_s26, 128, %s171_s25, %s159_s28  }
  0x28   : > { %179 = sbr.rel (%p732_p3) target bundleno = 243 (0xf3), region = 32  ;;  %s803_s10 = sand.u32 (!%p732_p3), 1, %s669_s13  }
  0x29   : > { %s435_s21 = sshll.u32 (!%p732_p3), %s803_s10, 3  ;;  %s182_s22 = scalar_lea.sflag (!%p732_p3), [#allocation3], %s803_s10 }
  0x2a   : > { %s809_s23 = scalar_lea.vmem (!%p732_p3), [#allocation2], %s435_s21 }
  0x2d   : > { %652 = dma.done.wait (%p765_p12), %s182_s22, 128  }
  0x2e   : > { %654 = vsyncadd (%p765_p12), %s182_s22, 4294967168 }
  0x2f   : > { %656 = dma.done.wait (%p41_p1), [#allocation6], 4128  }
  0x30   : > { %658 = vsyncadd (%p41_p1), [#allocation6], 4294963168  ;;  %v251_v0 = vld [vmem:[#allocation5 + $0xf8] sm:$0xff]  ;;  %v249_v1 = vld [vmem:[#allocation5 + $0xe8] sm:$0xff]  ;;  %s441_s20 = sshll.u32 %s727_s19, 3  ;;  %s218_s26 = scalar_lea.vmem [#allocation8], %s435_s21 }
  0x31   : > { %278 = vmatpush.msra.mxu1 %v251_v0  ;;  %v247_v2 = vld [vmem:[#allocation5 + $0xd8] sm:$0xff]  ;;  %v245_v3 = vld [vmem:[#allocation5 + $0xc8] sm:$0xff]  ;;  %v250_v4 = vld [vmem:[#allocation5 + $0xf0] sm:$0xff]  ;;  %s333_s25 = scalar_lea.hbm %s858_s3, %s441_s20  ;;  %s335_s19 = sshll.u32 %s218_s26, 4  ;;  %s336_s19 = int_to_ptr.vmem [resolvable:$true] %s335_s19 }
  0x32   : > { %v248_v5 = vld [vmem:[#allocation5 + $0xe0] sm:$0xff]  ;;  %258 = vmatpush.msra.mxu0 %v250_v4  ;;  %v243_v6 = vld [vmem:[#allocation5 + $0xb8] sm:$0xff]  ;;  %v246_v7 = vld [vmem:[#allocation5 + $0xd0] sm:$0xff]  ;;  %s337_s27 = sshll.u32 %s333_s25, 4  ;;  %s323_s28 = scalar_lea.sflag [#allocation4], %s803_s10  ;;  %s338_s27 = int_to_ptr.hbm [resolvable:$true] %s337_s27 }
  0x33   : > { %279 = vmatpush.msra.mxu1 %v249_v1  ;;  %v241_v8 = vld [vmem:[#allocation5 + $0xa8] sm:$0xff]  ;;  %v244_v9 = vld [vmem:[#allocation5 + $0xc0] sm:$0xff]  ;;  %v239_v10 = vld [vmem:[#allocation5 + $0x98] sm:$0xff]  ;;  %s621_s29 = sshra.s32 %s338_s27, 4  ;;  %s627_s17 = scalar_lea.hbm %s858_s3, 16  ;;  %s622_s29 = int_to_ptr.hbm [resolvable:$true] %s621_s29 }
  0x34   : > { %259 = vmatpush.msra.mxu0 %v248_v5  ;;  %v242_v11 = vld [vmem:[#allocation5 + $0xb0] sm:$0xff]  ;;  %v237_v12 = vld [vmem:[#allocation5 + $0x88] sm:$0xff]  ;;  %v240_v13 = vld [vmem:[#allocation5 + $0xa0] sm:$0xff]  ;;  %s623_s30 = scalar_lea.hbm %s622_s29, 8  ;;  %p628_p12 = scmp.lt.s32.totalorder %s622_s29, %s858_s3 }
  0x35   : > { %280 = vmatpush.msra.mxu1 %v247_v2  ;;  %v235_v14 = vld [vmem:[#allocation5 + $0x78] sm:$0xff]  ;;  %v238_v15 = vld [vmem:[#allocation5 + $0x90] sm:$0xff]  ;;  %v233_v16 = vld [vmem:[#allocation5 + $0x68] sm:$0xff]  ;;  %p624_p1 = scmp.ne.s32.totalorder %s622_s29, %s623_s30  ;;  %p629_p7 = scmp.lt.s32.totalorder %s627_s17, %s623_s30 }
  0x36   : > { %260 = vmatpush.msra.mxu0 %v246_v7  ;;  %v236_v17 = vld [vmem:[#allocation5 + $0x80] sm:$0xff]  ;;  %v231_v18 = vld [vmem:[#allocation5 + $0x58] sm:$0xff]  ;;  %v234_v19 = vld [vmem:[#allocation5 + $0x70] sm:$0xff] }
  0x37   : > { %281 = vmatpush.msra.mxu1 %v245_v3  ;;  %v229_v20 = vld [vmem:[#allocation5 + $0x48] sm:$0xff]  ;;  %v232_v21 = vld [vmem:[#allocation5 + $0x60] sm:$0xff]  ;;  %v227_v22 = vld [vmem:[#allocation5 + $0x38] sm:$0xff]  ;;  %p625_p3 = pnand %p624_p1, %p772_p4  ;;  %p630_p8 = por %p629_p7, %p628_p12 }
  0x38   : > { %261 = vmatpush.msra.mxu0 %v244_v9  ;;  %v230_v23 = vld [vmem:[#allocation5 + $0x50] sm:$0xff]  ;;  %v225_v24 = vld [vmem:[#allocation5 + $0x28] sm:$0xff]  ;;  %v228_v25 = vld [vmem:[#allocation5 + $0x40] sm:$0xff] }
  0x39   : > { %282 = vmatpush.msra.mxu1 %v243_v6  ;;  %v223_v26 = vld [vmem:[#allocation5 + $0x18] sm:$0xff]  ;;  %v226_v27 = vld [vmem:[#allocation5 + $0x30] sm:$0xff]  ;;  %v221_v28 = vld [vmem:[#allocation5 + $0x8] sm:$0xff]  ;;  %p626_p5 = pneg %p625_p3 }
  0x3a   : > { %262 = vmatpush.msra.mxu0 %v242_v11  ;;  %v224_v29 = vld [vmem:[#allocation5 + $0x20] sm:$0xff]  ;;  %v219_v30 = vld [vmem:[%s809_s23] sm:$0xff] }
  0x3b   : > { %283 = vmatpush.msra.mxu1 %v241_v8  ;;  %v222_v31 = vld [vmem:[#allocation5 + $0x10] sm:$0xff]  ;;  %v220_v32 = vld [vmem:[#allocation5] sm:$0xff]  ;;  %p631_p9 = pnand %p630_p8, %p626_p5 }
  0x3c   : > { %263 = vmatpush.msra.mxu0 %v240_v13  ;;  %v252_v33 = vld [vmem:[#allocation7] sm:$0x3] }
  0x3d   : > { %284 = vmatpush.msra.mxu1 %v239_v10  ;;  %v255_v34 = vperm.slane %v252_v33, 1  ;;  %v254_v40 = vperm.slane %v252_v33, 0 }
  0x3e   : > { %264 = vmatpush.msra.mxu0 %v238_v15 }
  0x3f   : > { %285 = vmatpush.msra.mxu1 %v237_v12 }
  0x40   : > { %265 = vmatpush.msra.mxu0 %v236_v17 }
  0x41   : > { %286 = vmatpush.msra.mxu1 %v235_v14 }
  0x42   : > { %266 = vmatpush.msra.mxu0 %v234_v19 }
  0x43   : > { %287 = vmatpush.msra.mxu1 %v233_v16 }
  0x44   : > { %267 = vmatpush.msra.mxu0 %v232_v21 }
  0x45   : > { %288 = vmatpush.msra.mxu1 %v231_v18 }
  0x46   : > { %268 = vmatpush.msra.mxu0 %v230_v23 }
  0x47   : > { %289 = vmatpush.msra.mxu1 %v229_v20 }
  0x48   : > { %269 = vmatpush.msra.mxu0 %v228_v25 }
  0x49   : > { %290 = vmatpush.msra.mxu1 %v227_v22 }
  0x4a   : > { %270 = vmatpush.msra.mxu0 %v226_v27 }
  0x4b   : > { %291 = vmatpush.msra.mxu1 %v225_v24 }
  0x4c   : > { %271 = vmatpush.msra.mxu0 %v224_v29 }
  0x4d   : > { %292 = vmatpush.msra.mxu1 %v223_v26 }
  0x4e   : > { %272 = vmatpush.msra.mxu0 %v222_v31 }
  0x4f   : > { %293 = vmatpush.msra.mxu1 %v221_v28 }
  0x50   : > { %294 = vmatmul.f32.vlgmr.msra.gmra.mxu1 %v219_v30  ;;  %273 = vmatpush.msra.mxu0 %v220_v32 }
  0x51   : > { %274 = vmatmul.f32.vlgmr.msra.gmra.mxu0 %v219_v30 }
  0xcd   : > { %v295_v35 = vpop.f32.mrf.mxu1 }
  0xce   : > { %v296_v36 = vadd.f32 %v295_v35, %v255_v34  ;;  %v275_v41 = vpop.f32.mrf.mxu0 }
  0xcf   : > { %v276_v42 = vadd.f32 %v275_v41, %v254_v40 }
  0xd0   : > { %v439_v37 = vmul.f32 -1.442695, %v296_v36 }
  0xd1   : > { %v298_v46 = vmax.f32 %v276_v42, 0.0 }
  0xd2   : > { %513 = vpow2.f32 %v439_v37 }
  0xd3   : > { %v318_v51 = vsub.f32 %v298_v46, %v219_v30 }
  0xd8   : > { %v514_v38 = vpop.eup %513 }
  0xd9   : > { %v302_v39 = vadd.f32 1.0, %v514_v38 }
  0xdb   : > { %515 = vrcp.f32 %v302_v39  ;;  %v314_v47 = vand.u32 2147483648, %v302_v39  ;;  %v312_v49 = vand.u32 2147483647, %v302_v39  ;;  %vm308_vm1 = vweird.f32 %v302_v39 }
  0xdd   : > { %v315_v52 = vor.u32 1.1754944e-38, %v314_v47  ;;  %vm313_vm3 = vcmp.eq.f32.partialorder %v312_v49, 8.507059e+37 }
  0xe1   : > { %v516_v43 = vpop.eup %515 }
  0xe2   : > { %v304_v44 = vmul.f32 %v516_v43, %v302_v39  ;;  %vm309_vm0 = vweird.f32 %v516_v43 }
  0xe3   : > { %vm310_vm2 = vmor %vm308_vm1, %vm309_vm0 }
  0xe4   : > { %v305_v45 = vsub.f32 1.0, %v304_v44 }
  0xe6   : > { %v306_v48 = vmul.f32 %v516_v43, %v305_v45 }
  0xe8   : > { %v307_v50 = vadd.f32 %v516_v43, %v306_v48 }
  0xea   : > { %v311_v53 = vsel %vm310_vm2, %v516_v43, %v307_v50 }
  0xeb   : > { %v316_v54 = vsel %vm313_vm3, %v315_v52, %v311_v53 }
  0xec   : > { %v319_v55 = vmul.f32 %v318_v51, %v316_v54 }
  0xee   : > { %v320_v56 = vadd.f32 %v319_v55, %v219_v30 }
  0xf0   : > { %321 = vst [vmem:[%s218_s26] sm:$0xff] %v320_v56 }
  0xf1   : > { %634 = shalt.err (!%p631_p9)
}
  0xf2   : > { %454 = dma.vmem_to_hbm [thread:$0]  (%p772_p4), %s336_s19, 128, %s338_s27, %s323_s28  }
  0xf3 PF: > { %s349_s10 = sand.u32 1, %s665_s12   ;;  %p865_p10 = scmp.ge.s32.totalorder %s677_s15, 2 }
  0xf4   : > { %s350_s21 = scalar_lea.sflag [#allocation4], %s349_s10 }
  0xf5   : > { %p468_p13 = pnand %p865_p10, %p776_p6 }
  0xf7   : > { %p469_p11 = pneg %p468_p13 }
  0xf9   : > { %660 = dma.done.wait (%p469_p11), %s350_s21, 128  }
  0xfa   : > { %662 = vsyncadd (%p469_p11), %s350_s21, 4294967168  ;;  %p17_p0 = scmp.ge.s32.totalorder %s746_s4, 4   ;;  %s866_s12 = smov %s669_s13 }
  0xfb   : > { %s867_s13 = smov %s673_s14  ;;  %s868_s14 = smov %s757_s7 }
  0xfc   : > { %s869_s15 = smov %s746_s4  ;;  %19 = sbr.rel (!%p17_p0) target bundleno = 6 (0x6), region = 85 }
 0x101   :  { %356 = vsyncpa [#allocation3], 1 }
 0x102   :  { %358 = vsyncpa [#allocation3 + $0x1], 1 }
 0x103   :  { %359 = vsyncpa [#allocation6], 1 }
 0x104   :  { %360 = vsyncpa [#allocation4], 1 }
 0x105   :  { %362 = vsyncpa [#allocation4 + $0x1], 1 }

</bundles_post_ra>
